<compile_context>
chip_gen: v6e
topology: v6e:2x2x1
jax: 0.10.0
libtpu: 0.0.40
codegen_flags: <defaults>
</compile_context>

<pallas_src>
import math

import jax
import jax.numpy as jnp
import numpy as np
from jax.experimental import pallas as pl
from jax.experimental.pallas import tpu as pltpu


_LN_10000 = math.log(10000.0)


# ----------------------------------------------------------------------------
# Kernels: pure streaming elementwise adds (memory bound, no MXU work).
# ----------------------------------------------------------------------------
def _pe_add_kernel(x_ref, pe_ref, o_ref):
    o_ref[...] = x_ref[...] + pe_ref[...]


def _pe_add_mask_kernel(x_ref, pe_ref, m_ref, o_ref):
    # pe / mask blocks may have size-1 batch or feature dims; jnp broadcasting
    # covers every combination ((B,tS,D) + (1,tS,D) * (B,tS,1), etc.).
    o_ref[...] = x_ref[...] + pe_ref[...] * m_ref[...]


# ----------------------------------------------------------------------------
# Wrapper-side PE slice (matches the PyTorch buffer layout exactly).
# ----------------------------------------------------------------------------
def _pe_table(S, D, offset_total, dtype):
    """(1, S, D) sinusoidal PE slice for positions offset_total + [0, S)."""
    d = np.arange(D)
    # Frequencies depend only on the static D: hoist to numpy at trace time.
    inv_freq = np.exp((2 * (d // 2)).astype(np.float32) * (-_LN_10000 / float(D)))
    even = jnp.asarray((d % 2) == 0)                                     # (D,)
    pos = (jnp.asarray(offset_total, jnp.int32)
           + jnp.arange(S, dtype=jnp.int32)).astype(jnp.float32)[:, None]  # (S,1)
    ang = pos * jnp.asarray(inv_freq)[None, :]                           # (S, D)
    pe = jnp.where(even, jnp.sin(ang), jnp.cos(ang))                     # (S, D)
    return pe.astype(dtype)[None]                                        # (1, S, D)


# ----------------------------------------------------------------------------
# Tiling heuristic.
# ----------------------------------------------------------------------------
def _round_down8(r):
    return max(8, (r // 8) * 8)


def _choose_tiling(B, S, D, itemsize, n_streams, seq_tile=None):
    """Pick (fold_batch, seq_tile).

    n_streams = number of (rows, D)-wide arrays that get double-buffered
    (x, out, pe, plus a full-width mask if present).  Budget is kept under the
    32 MiB vmem limit we request, which is safe on v5e/v6e (128 MiB physical)
    and v7x (64 MiB physical).
    """
    budget = 24 * 1024 * 1024
    per_block = max(budget // (2 * n_streams), 64 * 1024)
    row_bytes = max(D * itemsize, 1)
    max_rows = max(per_block // row_bytes, 8)

    # Keep n_s >= 2 whenever S allows it so the "parallel" seq axis feeds both
    # v7x TensorCores (no effect on v5e/v6e: single TC).
    if S >= 16:
        seq_cap = _round_down8(-(-S // 2))     # ~ceil(S/2), multiple of 8
    else:
        seq_cap = S

    fold = (max_rows // max(B, 1)) >= 8

    if seq_tile is not None:
        tS = int(seq_tile)
    else:
        rows = max_rows // B if fold else max_rows
        tS = min(_round_down8(rows), seq_cap)
    if tS >= S:
        tS = S                                  # full seq dim is always legal
    return fold, tS


# ----------------------------------------------------------------------------
# Public entry point (eval-mode PositionalEncoding.forward).
# ----------------------------------------------------------------------------
def positional_encoding(x, mask=None, *, dropout=0.1, max_len=5000,
                        offset_start=0, offset=0, seq_tile=None,
                        fold_batch=None, donate_x=False):
    """JAX/Pallas equivalent of PositionalEncoding.forward (eval mode).

    x:      [B, S, D]
    mask:   None, [B, S, D], [1, S, D], [B, S, 1] (streamed at natural shape),
            or anything broadcastable to [B, S, D] (fallback).
    offset: Python int or traced int scalar; enters only the wrapper-side PE
            computation, so the compiled kernel is offset-independent.
    """
    del dropout  # eval-mode dropout is the identity
    B, S, D = x.shape
    assert D % 2 == 0, "d_model must be even (matches the PyTorch pe buffer layout)"
    if isinstance(offset, (int, np.integer)):
        assert 0 <= int(offset) and int(offset) + S <= max_len, \
            "offset + seq_len exceeds the module's max_len buffer"

    pe = _pe_table(S, D, jnp.asarray(offset, jnp.int32) + jnp.int32(offset_start),
                   x.dtype)

    # Normalize mask to a rank-3 array we can stream at its natural shape.
    m = None
    if mask is not None:
        m = jnp.asarray(mask)
        if (m.ndim != 3 or m.shape[1] != S
                or m.shape[0] not in (1, B) or m.shape[2] not in (1, D)):
            m = jnp.broadcast_to(m, (B, S, D))
        m = m.astype(x.dtype)

    n_streams = 3 + (1 if (m is not None and m.shape[2] == D) else 0)
    fold, tS = _choose_tiling(B, S, D, x.dtype.itemsize, n_streams, seq_tile)
    if fold_batch is not None:
        fold = bool(fold_batch)
    assert tS == S or tS % 8 == 0, "seq_tile must be a multiple of 8 (or == S)"
    n_s = pl.cdiv(S, tS)   # ragged last block is fine: stores are masked

    if fold:
        grid = (n_s,)
        x_spec = pl.BlockSpec((B, tS, D), lambda s: (0, s, 0))
        pe_spec = pl.BlockSpec((1, tS, D), lambda s: (0, s, 0))

        def m_spec(mb, md):
            return pl.BlockSpec((mb, tS, md), lambda s: (0, s, 0))

        semantics = ("parallel",)
    else:
        grid = (n_s, B)
        x_spec = pl.BlockSpec((None, tS, D), lambda s, b: (b, s, 0))
        # PE block index ignores b (innermost) -> DMA'd once per seq tile and
        # reused across the whole batch axis.
        pe_spec = pl.BlockSpec((None, tS, D), lambda s, b: (0, s, 0))

        def m_spec(mb, md):
            if mb == 1:
                return pl.BlockSpec((None, tS, md), lambda s, b: (0, s, 0))
            return pl.BlockSpec((None, tS, md), lambda s, b: (b, s, 0))

        semantics = ("parallel", "arbitrary")

    cparams = pltpu.CompilerParams(
        dimension_semantics=semantics,
        vmem_limit_bytes=32 * 1024 * 1024,
    )
    out_shape = jax.ShapeDtypeStruct((B, S, D), x.dtype)
    io_alias = {0: 0} if donate_x else {}

    if m is None:
        return pl.pallas_call(
            _pe_add_kernel,
            out_shape=out_shape,
            grid=grid,
            in_specs=[x_spec, pe_spec],
            out_specs=x_spec,
            compiler_params=cparams,
            input_output_aliases=io_alias,
        )(x, pe)

    return pl.pallas_call(
        _pe_add_mask_kernel,
        out_shape=out_shape,
        grid=grid,
        in_specs=[x_spec, pe_spec, m_spec(m.shape[0], m.shape[2])],
        out_specs=x_spec,
        compiler_params=cparams,
        input_output_aliases=io_alias,
    )(x, pe, m)


# ----------------------------------------------------------------------------
# Pure-NumPy reference mirroring the PyTorch buffer construction.
# ----------------------------------------------------------------------------
def _reference(x, mask=None, *, max_len=5000, offset_start=0, offset=0):
    B, S, D = x.shape
    position = np.arange(offset_start, offset_start + max_len)[:, None].astype(np.float32)
    div_term = np.exp(np.arange(0, D, 2).astype(np.float32) * -(math.log(10000.0) / D))
    pe = np.zeros((max_len, D), dtype=np.float32)
    pe[:, 0::2] = np.sin(position * div_term)
    pe[:, 1::2] = np.cos(position * div_term)
    pe_slice = pe[None, offset:offset + S]
    xn = np.asarray(x)
    if mask is None:
        return xn + pe_slice
    return xn + pe_slice * np.asarray(mask)


if __name__ == "__main__":
    key = jax.random.PRNGKey(0)
    kx, km, k2, k3 = jax.random.split(key, 4)

    # Small shapes consistent with the module: B=2, S=8, D=32.
    B, S, D = 2, 8, 32
    x = jax.random.normal(kx, (B, S, D), dtype=jnp.float32)

    # 1) no mask, nonzero offset
    out = positional_encoding(x, mask=None, dropout=0.1, offset_start=0, offset=2)
    jax.block_until_ready(out)
    ref = _reference(x, None, offset_start=0, offset=2)
    np.testing.assert_allclose(np.asarray(out), np.asarray(ref), rtol=1e-5, atol=2e-5)

    # 2) per-position (B, S, 1) mask, streamed at its natural shape
    mask_pos = (jax.random.uniform(km, (B, S, 1)) > 0.3).astype(jnp.float32)
    out_m = positional_encoding(x, mask=mask_pos, offset=0)
    jax.block_until_ready(out_m)
    ref_m = _reference(x, mask_pos, offset=0)
    np.testing.assert_allclose(np.asarray(out_m), np.asarray(ref_m), rtol=1e-5, atol=2e-5)

    # 3) batch-broadcast (1, S, D) mask (no HBM broadcast)
    mask_bc = (jax.random.uniform(k2, (1, S, D)) > 0.5).astype(jnp.float32)
    out_b = positional_encoding(x, mask=mask_bc, offset=1)
    jax.block_until_ready(out_b)
    ref_b = _reference(x, mask_bc, offset=1)
    np.testing.assert_allclose(np.asarray(out_b), np.asarray(ref_b), rtol=1e-5, atol=2e-5)

    # 4) full (B, S, D) mask
    mask_full = (jax.random.uniform(k3, (B, S, D)) > 0.5).astype(jnp.float32)
    out_f = positional_encoding(x, mask=mask_full, offset=1)
    jax.block_until_ready(out_f)
    ref_f = _reference(x, mask_full, offset=1)
    np.testing.assert_allclose(np.asarray(out_f), np.asarray(ref_f), rtol=1e-5, atol=2e-5)

    # 5) multi seq-tile, lane-dense D=128, nonzero offset_start: batch-folded grid
    B2, S2, D2 = 2, 32, 128
    x2 = jax.random.normal(k2, (B2, S2, D2), dtype=jnp.float32)
    out2 = positional_encoding(x2, offset_start=3, offset=5, seq_tile=8)
    jax.block_until_ready(out2)
    ref2 = _reference(x2, None, offset_start=3, offset=5)
    np.testing.assert_allclose(np.asarray(out2), np.asarray(ref2), rtol=1e-5, atol=2e-5)

    # 6) same shapes, forcing the per-batch (n_s, B) grid path
    out3 = positional_encoding(x2, offset_start=3, offset=5, seq_tile=8, fold_batch=False)
    jax.block_until_ready(out3)
    np.testing.assert_allclose(np.asarray(out3), np.asarray(ref2), rtol=1e-5, atol=2e-5)

    print("KERNEL_OK")
</pallas_src>

<mosaic_0001>
module attributes {stable_mosaic.version = 11 : i64} {
  func.func @_pe_add_kernel(%arg0: i32, %arg1: memref<2x8x32xf32, #tpu.memory_space<vmem>>, %arg2: memref<1x8x32xf32, #tpu.memory_space<vmem>>, %arg3: memref<2x8x32xf32, #tpu.memory_space<vmem>>) attributes {dimension_semantics = [#tpu.dimension_semantics<parallel>], iteration_bounds = array<i64: 1>, scalar_prefetch = 0 : i64, scratch_operands = 0 : i64, tpu.core_type = #tpu.core_type<tc>, window_params = [{transform_indices = @transform_0, window_bounds = array<i64: 2, 8, 32>}, {transform_indices = @transform_1, window_bounds = array<i64: 1, 8, 32>}, {transform_indices = @transform_2, window_bounds = array<i64: 2, 8, 32>}]} {
    %c0 = arith.constant 0 : index
    %c0_0 = arith.constant 0 : index
    %c0_1 = arith.constant 0 : index
    %0 = vector.load %arg1[%c0, %c0_0, %c0_1] : memref<2x8x32xf32, #tpu.memory_space<vmem>>, vector<2x8x32xf32>
    %c0_2 = arith.constant 0 : index
    %c0_3 = arith.constant 0 : index
    %c0_4 = arith.constant 0 : index
    %1 = vector.load %arg2[%c0_2, %c0_3, %c0_4] : memref<1x8x32xf32, #tpu.memory_space<vmem>>, vector<1x8x32xf32>
    %2 = vector.broadcast %1 : vector<1x8x32xf32> to vector<2x8x32xf32>
    %3 = arith.addf %0, %2 : vector<2x8x32xf32>
    %c0_5 = arith.constant 0 : index
    %c0_6 = arith.constant 0 : index
    %c0_7 = arith.constant 0 : index
    %4 = vector.load %arg3[%c0_5, %c0_6, %c0_7] : memref<2x8x32xf32, #tpu.memory_space<vmem>>, vector<2x8x32xf32>
    tpu.vector_store %arg3[%c0_5, %c0_6, %c0_7], %3 {strides = array<i32>} : memref<2x8x32xf32, #tpu.memory_space<vmem>>, vector<2x8x32xf32>,
    return
  }
  func.func @transform_0(%arg0: i32) -> (i32, i32, i32) {
    %c0_i32 = arith.constant 0 : i32
    %c0_i32_0 = arith.constant 0 : i32
    %c0_i32_1 = arith.constant 0 : i32
    return %c0_i32, %arg0, %c0_i32_0 : i32, i32, i32
  }
  func.func @transform_1(%arg0: i32) -> (i32, i32, i32) {
    %c0_i32 = arith.constant 0 : i32
    %c0_i32_0 = arith.constant 0 : i32
    %c0_i32_1 = arith.constant 0 : i32
    return %c0_i32, %arg0, %c0_i32_0 : i32, i32, i32
  }
  func.func @transform_2(%arg0: i32) -> (i32, i32, i32) {
    %c0_i32 = arith.constant 0 : i32
    %c0_i32_0 = arith.constant 0 : i32
    %c0_i32_1 = arith.constant 0 : i32
    return %c0_i32, %arg0, %c0_i32_0 : i32, i32, i32
  }
}

</mosaic_0001>

<bundles_post_ra>
// kernel: tpu_custom_call.1
= control target key start
LH: loop header
LB: loop body
LE: loop exit
PB: predicated region body
PF: predicated region fallthrough
CT: control target
= control target key end

     0   :  { %7 = vsyncpa [#allocation3], 0  ;;  %s170_s0 = inlined_call_operand.hbm [shape: f32[2,8,32], index: 0, kind: input, shape index: {}]   ;;  %s171_s1 = inlined_call_operand.hbm [shape: f32[1,8,32], index: 1, kind: input, shape index: {}]   ;;  %s172_s2 = inlined_call_operand.hbm [shape: f32[2,8,32], index: 2, kind: output, shape index: {}]  }
   0x1   :  { %8 = vsyncpa [#allocation6], 0 }
   0x2   :  { %9 = vsyncpa [#allocation4], 0  ;;  %s135_s9 = smov [#allocation2]  }
   0x3   :  { %s15_s10 = sshll.u32 %s135_s9, 4  ;;  %s16_s10 = int_to_ptr.vmem [resolvable:$true] %s15_s10 }
   0x4   :  { %s77_s11 = scalar_lea.vmem %s16_s10, 256  ;;  %p82_p1 = scmp.lt.s32.totalorder %s16_s10, %s16_s10 }
   0x5   :  { %p78_p0 = scmp.ne.s32.totalorder %s16_s10, %s77_s11  ;;  %p83_p2 = scmp.lt.s32.totalorder %s77_s11, %s77_s11 }
   0x7   :  { %p84_p3 = por %p83_p2, %p82_p1 }
   0x9   :  { %p85_p4 = pnand %p84_p3, %p78_p0 }
   0xb   :  { %88 = shalt.err (!%p85_p4)
}
   0xc   :  { %s136_s12 = smov 128   ;;  %s137_s13 = smov 8  }
   0xd   :  { %21 = dma.hbm_to_vmem [thread:$0]  %s170_s0, 256, %s16_s10, [#allocation3], %s136_s12, %s136_s12, %s137_s13  }
   0xe   :  { %s138_s16 = smov [#allocation5]  }
   0xf   :  { %s28_s17 = sshll.u32 %s138_s16, 4  ;;  %s29_s17 = int_to_ptr.vmem [resolvable:$true] %s28_s17 }
  0x10   :  { %s97_s18 = scalar_lea.vmem %s29_s17, 128  ;;  %p102_p6 = scmp.lt.s32.totalorder %s29_s17, %s29_s17 }
  0x11   :  { %p98_p5 = scmp.ne.s32.totalorder %s29_s17, %s97_s18  ;;  %p103_p7 = scmp.lt.s32.totalorder %s97_s18, %s97_s18 }
  0x13   :  { %p104_p8 = por %p103_p7, %p102_p6 }
  0x15   :  { %p105_p9 = pnand %p104_p8, %p98_p5 }
  0x17   :  { %108 = shalt.err (!%p105_p9)
}
  0x18   :  { %31 = dma.hbm_to_vmem [thread:$0]  %s171_s1, 128, %s29_s17, [#allocation6]  }
  0x19   :  { %129 = dma.done.wait [#allocation3], 256  }
  0x1a   :  { %130 = vsyncadd [#allocation3], 4294967040 }
  0x1b   :  { %131 = dma.done.wait [#allocation6], 128  }
  0x1c   :  { %132 = vsyncadd [#allocation6], 4294967168  ;;  %s139_s21 = smov [#allocation7]   ;;  %v38_v0 = vld [vmem:[#allocation2] sm:$0xff]  ;;  %v40_v1 = vld [vmem:[#allocation5] sm:$0xff]  ;;  %vm43_vm0 = vcmask 261120  }
  0x1d   :  { %s51_s0 = sshll.u32 %s139_s21, 4  ;;  %v39_v2 = vld [vmem:[#allocation2 + $0x8] sm:$0xff]  ;;  %v41_v3 = vadd.f32 %v40_v1, %v38_v0  ;;  %s52_s0 = int_to_ptr.vmem [resolvable:$true] %s51_s0 }
  0x1e   :  { %v42_v4 = vadd.f32 %v40_v1, %v39_v2  ;;  %s109_s22 = scalar_lea.vmem %s52_s0, 256  ;;  %p114_p11 = scmp.lt.s32.totalorder %s52_s0, %s52_s0 }
  0x1f   :  { %44 = vst.msk [vmem:[#allocation7] sm:$0xff] %vm43_vm0, %v41_v3  ;;  %p110_p10 = scmp.ne.s32.totalorder %s52_s0, %s109_s22  ;;  %p115_p12 = scmp.lt.s32.totalorder %s109_s22, %s109_s22 }
  0x20   :  { %45 = vst.msk [vmem:[#allocation7 + $0x8] sm:$0xff] %vm43_vm0, %v42_v4 }
  0x21   :  { %p116_p13 = por %p115_p12, %p114_p11 }
  0x23   :  { %p117_p0 = pnand %p116_p13, %p110_p10 }
  0x25   :  { %120 = shalt.err (!%p117_p0)
}
  0x26   :  { %57 = dma.vmem_to_hbm [thread:$0]  %s52_s0, 256, %s172_s2, [#allocation4], %s136_s12, %s136_s12, %s137_s13  }
  0x27   :  { %133 = dma.done.wait [#allocation4], 256  }
  0x28   :  { %134 = vsyncadd [#allocation4], 4294967040 }
  0x29   :  { %61 = vsyncpa [#allocation3], 1 }
  0x2a   :  { %62 = vsyncpa [#allocation6], 1 }
  0x2b   :  { %63 = vsyncpa [#allocation4], 1 }

</bundles_post_ra>
